<compile_context>
chip_gen: v7x
topology: tpu7x:2x2x1
jax: 0.10.0
libtpu: 0.0.40
codegen_flags: <defaults>
</compile_context>

<pallas_src>
import functools

import jax
import jax.numpy as jnp
from jax.experimental import pallas as pl
from jax.experimental.pallas import tpu as pltpu

_MIB = 1024 * 1024


def _round_up(x, m):
    return (x + m - 1) // m * m


def _pad_unit(d):
    # v6e/v7x MXUs are 2x256x256: use 256-multiples when the waste is a small
    # fraction of the dim; otherwise 128 (always optimal on v5e's 4x128x128).
    return 256 if d >= 1024 else 128


def _vmem_capacity_bytes():
    try:
        return int(pltpu.get_tpu_info().vmem_capacity_bytes)
    except Exception:
        return 64 * _MIB  # conservative fallback: v7x per-TensorCore VMEM


def mlp_kernel(x_ref, w1_ref, b1_ref, w2_ref, b2_ref, o_ref):
    """relu(relu(X @ W1 + b1) @ W2 + b2) for one tm-row activation tile."""
    x = x_ref[...].astype(w1_ref.dtype)                     # bf16 for the MXU
    h = jnp.dot(x, w1_ref[...], preferred_element_type=jnp.float32)
    h = jnp.maximum(h + b1_ref[...], 0.0)                   # bias + ReLU in f32
    o = jnp.dot(h.astype(w2_ref.dtype), w2_ref[...],
                preferred_element_type=jnp.float32)
    o = jnp.maximum(o + b2_ref[...], 0.0)                   # bias + ReLU in f32
    o_ref[...] = o.astype(o_ref.dtype)


def prepare_params(w1, b1, w2, b2, *, compute_dtype=jnp.bfloat16):
    """Pad (lane-align) + cast weights ONCE at init; cache the result.

    Weights are stored (in, out) — transposed vs. PyTorch — so the kernel
    issues plain X @ W matmuls.  Zero padding is exact: padded K-columns
    contribute 0; padded H-columns see bias 0 -> relu(0)=0 -> hit zero rows of
    W2 -> 0, and are sliced off after the kernel.
    """
    D, H = w1.shape
    Dp = _round_up(D, _pad_unit(D))
    Hp = _round_up(H, _pad_unit(H))
    w1_p = jnp.pad(w1.astype(compute_dtype), ((0, Dp - D), (0, Hp - H)))
    w2_p = jnp.pad(w2.astype(compute_dtype), ((0, Hp - H), (0, Hp - H)))
    b1_p = jnp.pad(b1.astype(jnp.float32), (0, Hp - H)).reshape(1, Hp)
    b2_p = jnp.pad(b2.astype(jnp.float32), (0, Hp - H)).reshape(1, Hp)
    return (w1_p, b1_p, w2_p, b2_p), (D, H, Dp, Hp)


def simple_mlp_forward(x, w1_p, b1_p, w2_p, b2_p, *, dims,
                       out_dtype=None, tm_max=None):
    """x: [B, T, D] -> [B, T, H] using pre-padded weights from prepare_params."""
    B, T, D_in = x.shape
    D, H, Dp, Hp = dims
    assert D_in == D, (D_in, D)

    compute_dtype = w1_p.dtype
    out_dtype = compute_dtype if out_dtype is None else out_dtype
    cd_b = jnp.dtype(compute_dtype).itemsize
    out_b = jnp.dtype(out_dtype).itemsize

    M = B * T
    M8 = _round_up(M, 8)

    # ---- derive the VMEM budget per generation; pick tm from the footprint ----
    cap = _vmem_capacity_bytes()                         # 64 MiB v7x, 128 MiB v5e/v6e
    cap_limit = min(cap - 8 * _MIB, int(0.875 * cap))    # ~56 MiB v7x, ~112 MiB v5e/v6e
    budget = cap_limit - 4 * _MIB                        # headroom for compiler scratch

    if tm_max is None:
        tm_max = 1024 if cap >= 128 * _MIB else 512      # bigger tiles on 128 MiB parts

    # Single-buffered, VMEM-resident weights + biases.
    w_resident = (Dp * Hp + Hp * Hp) * cd_b + 2 * Hp * 4
    # TODO(synk): when w_resident alone blows the budget (H >= ~4k on v7x), tile
    # the second layer over Hp with an f32 accumulator instead of a resident W2.

    x_b = cd_b if Dp != D else jnp.dtype(x.dtype).itemsize

    def footprint(tm):
        x_bufs = 2 * tm * Dp * x_b          # double-buffered activation tile
        o_bufs = 2 * tm * Hp * out_b        # double-buffered output tile
        temps = tm * Hp * (4 + cd_b + 4)    # h(f32) + h(bf16) + o(f32) temporaries
        return x_bufs + o_bufs + w_resident + temps

    # >= 2 grid steps whenever there is enough work so both v7x TensorCores get
    # a share; choose tm to minimise tail padding (Mp - M8), not a flat 512.
    n_steps = pl.cdiv(M8, tm_max)
    if M8 > 256:
        n_steps = max(n_steps, 2)
    tm = _round_up(pl.cdiv(M8, n_steps), 8)
    while footprint(tm) > budget and tm > 8:
        tm = max(8, _round_up(tm // 2, 8))
    Mp = _round_up(M8, tm)

    vmem_limit = int(max(32 * _MIB, min(cap_limit, footprint(tm) + 16 * _MIB)))

    # ---- activations: pad only the deficient dims (weights are pre-padded) ----
    if Dp != D:
        x2d = jnp.pad(x.reshape(M, D).astype(compute_dtype),
                      ((0, Mp - M), (0, Dp - D)))
    elif Mp != M:
        x2d = jnp.pad(x.reshape(M, D), ((0, Mp - M), (0, 0)))
    else:
        x2d = x.reshape(M, D)        # no extra HBM pass; bf16 cast happens in-kernel

    grid = (Mp // tm,)
    out = pl.pallas_call(
        mlp_kernel,
        out_shape=jax.ShapeDtypeStruct((Mp, Hp), out_dtype),
        grid_spec=pltpu.PrefetchScalarGridSpec(
            num_scalar_prefetch=0,
            grid=grid,
            in_specs=[
                # x tile: pipelined (double-buffered) over the M axis.
                pl.BlockSpec((tm, Dp), lambda i: (i, 0)),
                # Weights / biases: constant index -> VMEM-resident, single-buffered.
                pl.BlockSpec((Dp, Hp), lambda i: (0, 0),
                             pipeline_mode=pl.Buffered(1)),
                pl.BlockSpec((1, Hp), lambda i: (0, 0),
                             pipeline_mode=pl.Buffered(1)),
                pl.BlockSpec((Hp, Hp), lambda i: (0, 0),
                             pipeline_mode=pl.Buffered(1)),
                pl.BlockSpec((1, Hp), lambda i: (0, 0),
                             pipeline_mode=pl.Buffered(1)),
            ],
            out_specs=pl.BlockSpec((tm, Hp), lambda i: (i, 0)),
        ),
        compiler_params=pltpu.CompilerParams(
            dimension_semantics=("parallel",),           # shard M across TCs (v7x)
            vmem_limit_bytes=vmem_limit,
        ),
    )(x2d, w1_p, b1_p, w2_p, b2_p)

    return out[:M, :H].reshape(B, T, H)


def init_params(key, input_dim, h_dim):
    """Deterministic synthetic init (PyTorch-like uniform ranges), (in, out) layout."""
    k1, k2, k3, k4 = jax.random.split(key, 4)
    lim1 = 1.0 / (input_dim ** 0.5)
    lim2 = 1.0 / (h_dim ** 0.5)
    w1 = jax.random.uniform(k1, (input_dim, h_dim), jnp.float32, -lim1, lim1)
    b1 = jax.random.uniform(k2, (h_dim,), jnp.float32, -lim1, lim1)
    w2 = jax.random.uniform(k3, (h_dim, h_dim), jnp.float32, -lim2, lim2)
    b2 = jax.random.uniform(k4, (h_dim,), jnp.float32, -lim2, lim2)
    return w1, b1, w2, b2


if __name__ == "__main__":
    # Small shapes consistent with SimpleMLP(input_dim, h_dim, m_tokens).
    B, m_tokens, input_dim, h_dim = 2, 8, 16, 32

    key = jax.random.PRNGKey(0)
    kx, kp = jax.random.split(key)
    x = jax.random.normal(kx, (B, m_tokens, input_dim), jnp.float32)
    w1, b1, w2, b2 = init_params(kp, input_dim, h_dim)

    # Pad + cast weights ONCE (cached across forwards).
    (w1_p, b1_p, w2_p, b2_p), dims = prepare_params(w1, b1, w2, b2)

    fwd = jax.jit(functools.partial(simple_mlp_forward, dims=dims))
    out = jax.block_until_ready(fwd(x, w1_p, b1_p, w2_p, b2_p))

    # Pure-JAX f32 reference.  The kernel runs the MXU in bf16 (f32 accumulation)
    # and emits bf16 output, so use a bf16-appropriate tolerance.
    ref = jnp.maximum(x @ w1 + b1, 0.0)
    ref = jnp.maximum(ref @ w2 + b2, 0.0)
    assert out.shape == (B, m_tokens, h_dim)
    err = float(jnp.max(jnp.abs(out.astype(jnp.float32) - ref)))
    assert err < 5e-2, err

    print("KERNEL_OK")
</pallas_src>

<mosaic_0001>
module attributes {stable_mosaic.version = 11 : i64} {
  func.func @mlp_kernel(%arg0: i32, %arg1: memref<16x128xbf16, #tpu.memory_space<vmem>>, %arg2: memref<128x128xbf16, #tpu.memory_space<vmem>>, %arg3: memref<1x128xf32, #tpu.memory_space<vmem>>, %arg4: memref<128x128xbf16, #tpu.memory_space<vmem>>, %arg5: memref<1x128xf32, #tpu.memory_space<vmem>>, %arg6: memref<16x128xbf16, #tpu.memory_space<vmem>>) attributes {dimension_semantics = [#tpu.dimension_semantics<parallel>], iteration_bounds = array<i64: 1>, scalar_prefetch = 0 : i64, scratch_operands = 0 : i64, tpu.core_type = #tpu.core_type<tc>, window_params = [{transform_indices = @transform_0, window_bounds = array<i64: 16, 128>}, {pipeline_mode = #tpu.pipeline_mode<synchronous>, transform_indices = @transform_1, window_bounds = array<i64: 128, 128>}, {pipeline_mode = #tpu.pipeline_mode<synchronous>, transform_indices = @transform_2, window_bounds = array<i64: 1, 128>}, {pipeline_mode = #tpu.pipeline_mode<synchronous>, transform_indices = @transform_3, window_bounds = array<i64: 128, 128>}, {pipeline_mode = #tpu.pipeline_mode<synchronous>, transform_indices = @transform_4, window_bounds = array<i64: 1, 128>}, {transform_indices = @transform_5, window_bounds = array<i64: 16, 128>}]} {
    %c0 = arith.constant 0 : index
    %c0_0 = arith.constant 0 : index
    %0 = vector.load %arg1[%c0, %c0_0] : memref<16x128xbf16, #tpu.memory_space<vmem>>, vector<16x128xbf16>
    %c0_1 = arith.constant 0 : index
    %c0_2 = arith.constant 0 : index
    %1 = vector.load %arg2[%c0_1, %c0_2] : memref<128x128xbf16, #tpu.memory_space<vmem>>, vector<128x128xbf16>
    %cst = arith.constant dense<0.000000e+00> : vector<16x128xf32>
    %2 = tpu.matmul %0, %1, %cst {dimension_numbers = #tpu.dot_dimension_numbers<[1], [0], [0], [1], [0, 0, 1, 1], [], []>} : vector<16x128xbf16>, vector<128x128xbf16>, vector<16x128xf32> -> vector<16x128xf32>
    %c0_3 = arith.constant 0 : index
    %c0_4 = arith.constant 0 : index
    %3 = vector.load %arg3[%c0_3, %c0_4] : memref<1x128xf32, #tpu.memory_space<vmem>>, vector<1x128xf32>
    %4 = vector.broadcast %3 : vector<1x128xf32> to vector<16x128xf32>
    %5 = arith.addf %2, %4 : vector<16x128xf32>
    %cst_5 = arith.constant 0.000000e+00 : f32
    %6 = vector.broadcast %cst_5 : f32 to vector<16x128xf32>
    %7 = arith.maximumf %5, %6 : vector<16x128xf32>
    %8 = arith.truncf %7 : vector<16x128xf32> to vector<16x128xbf16>
    %c0_6 = arith.constant 0 : index
    %c0_7 = arith.constant 0 : index
    %9 = vector.load %arg4[%c0_6, %c0_7] : memref<128x128xbf16, #tpu.memory_space<vmem>>, vector<128x128xbf16>
    %cst_8 = arith.constant dense<0.000000e+00> : vector<16x128xf32>
    %10 = tpu.matmul %8, %9, %cst_8 {dimension_numbers = #tpu.dot_dimension_numbers<[1], [0], [0], [1], [0, 0, 1, 1], [], []>} : vector<16x128xbf16>, vector<128x128xbf16>, vector<16x128xf32> -> vector<16x128xf32>
    %c0_9 = arith.constant 0 : index
    %c0_10 = arith.constant 0 : index
    %11 = vector.load %arg5[%c0_9, %c0_10] : memref<1x128xf32, #tpu.memory_space<vmem>>, vector<1x128xf32>
    %12 = vector.broadcast %11 : vector<1x128xf32> to vector<16x128xf32>
    %13 = arith.addf %10, %12 : vector<16x128xf32>
    %cst_11 = arith.constant 0.000000e+00 : f32
    %14 = vector.broadcast %cst_11 : f32 to vector<16x128xf32>
    %15 = arith.maximumf %13, %14 : vector<16x128xf32>
    %16 = arith.truncf %15 : vector<16x128xf32> to vector<16x128xbf16>
    %c0_12 = arith.constant 0 : index
    %c0_13 = arith.constant 0 : index
    %17 = vector.load %arg6[%c0_12, %c0_13] : memref<16x128xbf16, #tpu.memory_space<vmem>>, vector<16x128xbf16>
    tpu.vector_store %arg6[%c0_12, %c0_13], %16 {strides = array<i32>} : memref<16x128xbf16, #tpu.memory_space<vmem>>, vector<16x128xbf16>,
    return
  }
  func.func @transform_0(%arg0: i32) -> (i32, i32) {
    %c0_i32 = arith.constant 0 : i32
    %c0_i32_0 = arith.constant 0 : i32
    return %arg0, %c0_i32 : i32, i32
  }
  func.func @transform_1(%arg0: i32) -> (i32, i32) {
    %c0_i32 = arith.constant 0 : i32
    %c0_i32_0 = arith.constant 0 : i32
    %c0_i32_1 = arith.constant 0 : i32
    return %c0_i32, %c0_i32_0 : i32, i32
  }
  func.func @transform_2(%arg0: i32) -> (i32, i32) {
    %c0_i32 = arith.constant 0 : i32
    %c0_i32_0 = arith.constant 0 : i32
    %c0_i32_1 = arith.constant 0 : i32
    return %c0_i32, %c0_i32_0 : i32, i32
  }
  func.func @transform_3(%arg0: i32) -> (i32, i32) {
    %c0_i32 = arith.constant 0 : i32
    %c0_i32_0 = arith.constant 0 : i32
    %c0_i32_1 = arith.constant 0 : i32
    return %c0_i32, %c0_i32_0 : i32, i32
  }
  func.func @transform_4(%arg0: i32) -> (i32, i32) {
    %c0_i32 = arith.constant 0 : i32
    %c0_i32_0 = arith.constant 0 : i32
    %c0_i32_1 = arith.constant 0 : i32
    return %c0_i32, %c0_i32_0 : i32, i32
  }
  func.func @transform_5(%arg0: i32) -> (i32, i32) {
    %c0_i32 = arith.constant 0 : i32
    %c0_i32_0 = arith.constant 0 : i32
    return %arg0, %c0_i32 : i32, i32
  }
}

</mosaic_0001>

<bundles_post_ra>
// kernel: simple_mlp_forward.1
= control target key start
LH: loop header
LB: loop body
LE: loop exit
PB: predicated region body
PF: predicated region fallthrough
CT: control target
= control target key end

     0   :  { %10 = vsyncpa [#allocation3], 0  ;;  %s531_s0 = inlined_call_operand.vmem [shape: bf16[16,128], index: 0, kind: input, shape index: {}]   ;;  %s532_s1 = inlined_call_operand.hbm [shape: bf16[128,128], index: 1, kind: input, shape index: {}]   ;;  %s533_s2 = inlined_call_operand.vmem [shape: f32[1,128], index: 2, kind: input, shape index: {}]   ;;  %s534_s3 = inlined_call_operand.hbm [shape: bf16[128,128], index: 3, kind: input, shape index: {}]   ;;  %s535_s4 = inlined_call_operand.vmem [shape: f32[1,128], index: 4, kind: input, shape index: {}]   ;;  %s536_s5 = inlined_call_operand.vmem [shape: bf16[16,128], index: 5, kind: output, shape index: {}]  }
   0x1   :  { %11 = vsyncpa [#allocation5], 0  ;;  %s459_s18 = smov [#allocation2]   ;;  %s411_s22 = scalar_lea.hbm %s532_s1, 1024 }
   0x2   :  { %s19_s19 = sshll.u32 %s459_s18, 4  ;;  %p412_p0 = scmp.ne.s32.totalorder %s532_s1, %s411_s22  ;;  %s20_s19 = int_to_ptr.vmem [resolvable:$true] %s19_s19 }
   0x3   :  { %p415_p1 = scmp.lt.u32.totalorder %s411_s22, %s532_s1 }
   0x5   :  { %p417_p2 = pnand %p415_p1, %p412_p0 }
   0x7   :  { %420 = shalt.err (!%p417_p2)
}
   0x8   :  { %s421_s27 = scalar_lea.vmem %s20_s19, 1024  ;;  %p426_p4 = scmp.lt.s32.totalorder %s20_s19, %s20_s19 }
   0x9   :  { %p422_p3 = scmp.ne.s32.totalorder %s20_s19, %s421_s27  ;;  %p427_p5 = scmp.lt.s32.totalorder %s421_s27, %s421_s27 }
   0xb   :  { %p428_p6 = por %p427_p5, %p426_p4 }
   0xd   :  { %p429_p7 = pnand %p428_p6, %p422_p3 }
   0xf   :  { %432 = shalt.err (!%p429_p7)
}
  0x10   :  { %s460_s28 = smov 64   ;;  %s461_s29 = smov 4  }
  0x11   :  { %25 = dma.hbm_to_vmem [thread:$0]  %s532_s1, 1024, %s20_s19, [#allocation3], %s460_s28, %s460_s28, %s461_s29  }
  0x12   :  { %s462_s7 = smov [#allocation4]   ;;  %s433_s11 = scalar_lea.hbm %s534_s3, 1024 }
  0x13   :  { %s33_s8 = sshll.u32 %s462_s7, 4  ;;  %p434_p8 = scmp.ne.s32.totalorder %s534_s3, %s433_s11  ;;  %s34_s8 = int_to_ptr.vmem [resolvable:$true] %s33_s8 }
  0x14   :  { %p437_p9 = scmp.lt.u32.totalorder %s433_s11, %s534_s3 }
  0x16   :  { %p439_p10 = pnand %p437_p9, %p434_p8 }
  0x18   :  { %442 = shalt.err (!%p439_p10)
}
  0x19   :  { %s443_s16 = scalar_lea.vmem %s34_s8, 1024  ;;  %p448_p12 = scmp.lt.s32.totalorder %s34_s8, %s34_s8 }
  0x1a   :  { %p444_p11 = scmp.ne.s32.totalorder %s34_s8, %s443_s16  ;;  %p449_p13 = scmp.lt.s32.totalorder %s443_s16, %s443_s16 }
  0x1c   :  { %p450_p0 = por %p449_p13, %p448_p12 }
  0x1e   :  { %p451_p1 = pnand %p450_p0, %p444_p11 }
  0x20   :  { %454 = shalt.err (!%p451_p1)
}
  0x21   :  { %39 = dma.hbm_to_vmem [thread:$0]  %s534_s3, 1024, %s34_s8, [#allocation5], %s460_s28, %s460_s28, %s461_s29  }
  0x22   :  { %455 = dma.done.wait [#allocation3], 1024  }
  0x23   :  { %456 = vsyncadd [#allocation3], 4294966272 }
  0x24   :  { %457 = dma.done.wait [#allocation5], 1024  }
  0x25   :  { %458 = vsyncadd [#allocation5], 4294966272  ;;  %v463_v0 = vmov 0.0   ;;  %vm464_vm0 = vmmov 0   ;;  %v394_v1 = vld [vmem:[#allocation2] sm:$0xff]   ;;  %v395_v2 = vld [vmem:[#allocation2 + $0x8] sm:$0xff]  }
  0x26   :  { %348 = vmatprep.subr.bf16.mxu0 %v463_v0  ;;  %364 = vmatprep.mubr.msk.bf16.mxu0 %vm464_vm0, %v463_v0  ;;  %v396_v3 = vld [vmem:[#allocation2 + $0x10] sm:$0xff]   ;;  %v403_v4 = vld [vmem:[#allocation4] sm:$0xff]   ;;  %v397_v5 = vld [vmem:[#allocation2 + $0x18] sm:$0xff]  }
  0x27   :  { %368 = vmatprep.subr.bf16.mxu1 %v463_v0  ;;  %384 = vmatprep.mubr.msk.bf16.mxu1 %vm464_vm0, %v463_v0  ;;  %v404_v6 = vld [vmem:[#allocation4 + $0x8] sm:$0xff]   ;;  %v398_v7 = vld [vmem:[#allocation2 + $0x20] sm:$0xff]   ;;  %v405_v8 = vld [vmem:[#allocation4 + $0x10] sm:$0xff]  }
  0x28   :  { %349 = vmatpush3.bf16.msra.mxu0 %v394_v1  ;;  %369 = vmatpush3.bf16.msra.mxu1 %v403_v4  ;;  %v399_v9 = vld [vmem:[#allocation2 + $0x28] sm:$0xff]   ;;  %v406_v10 = vld [vmem:[#allocation4 + $0x18] sm:$0xff]   ;;  %v400_v11 = vld [vmem:[#allocation2 + $0x30] sm:$0xff]  }
  0x29   :  { %350 = vmatprep.subr.bf16.mxu0 %v463_v0  ;;  %370 = vmatprep.subr.bf16.mxu1 %v463_v0  ;;  %v407_v12 = vld [vmem:[#allocation4 + $0x20] sm:$0xff]   ;;  %v401_v13 = vld [vmem:[#allocation2 + $0x38] sm:$0xff]   ;;  %v408_v14 = vld [vmem:[#allocation4 + $0x28] sm:$0xff]  }
  0x2a   :  { %v402_v15 = vld [vmem:[%s531_s0] sm:$0xff]   ;;  %v409_v16 = vld [vmem:[#allocation4 + $0x30] sm:$0xff]   ;;  %v410_v17 = vld [vmem:[#allocation4 + $0x38] sm:$0xff]  }
  0x2b   :  { %v302_v18 = vld [vmem:[%s533_s2] ss:$0 sm:$0xff] }
  0x2c   :  { %351 = vmatpush3.bf16.msra.mxu0 %v395_v2  ;;  %371 = vmatpush3.bf16.msra.mxu1 %v404_v6  ;;  %v312_v28 = vld [vmem:[%s535_s4] ss:$0 sm:$0xff] }
  0x2d   :  { %352 = vmatprep.subr.bf16.mxu0 %v463_v0  ;;  %372 = vmatprep.subr.bf16.mxu1 %v463_v0 }
  0x30   :  { %353 = vmatpush3.bf16.msra.mxu0 %v396_v3  ;;  %373 = vmatpush3.bf16.msra.mxu1 %v405_v8 }
  0x31   :  { %354 = vmatprep.subr.bf16.mxu0 %v463_v0  ;;  %374 = vmatprep.subr.bf16.mxu1 %v463_v0 }
  0x34   :  { %355 = vmatpush3.bf16.msra.mxu0 %v397_v5  ;;  %375 = vmatpush3.bf16.msra.mxu1 %v406_v10 }
  0x35   :  { %356 = vmatprep.subr.bf16.mxu0 %v463_v0  ;;  %376 = vmatprep.subr.bf16.mxu1 %v463_v0 }
  0x38   :  { %357 = vmatpush3.bf16.msra.mxu0 %v398_v7  ;;  %377 = vmatpush3.bf16.msra.mxu1 %v407_v12 }
  0x39   :  { %358 = vmatprep.subr.bf16.mxu0 %v463_v0  ;;  %378 = vmatprep.subr.bf16.mxu1 %v463_v0 }
  0x3c   :  { %359 = vmatpush3.bf16.msra.mxu0 %v399_v9  ;;  %379 = vmatpush3.bf16.msra.mxu1 %v408_v14 }
  0x3d   :  { %360 = vmatprep.subr.bf16.mxu0 %v463_v0  ;;  %380 = vmatprep.subr.bf16.mxu1 %v463_v0 }
  0x40   :  { %361 = vmatpush3.bf16.msra.mxu0 %v400_v11  ;;  %381 = vmatpush3.bf16.msra.mxu1 %v409_v16 }
  0x41   :  { %362 = vmatprep.subr.bf16.mxu0 %v463_v0  ;;  %382 = vmatprep.subr.bf16.mxu1 %v463_v0 }
  0x44   :  { %363 = vmatpush3.bf16.msra.mxu0 %v401_v13  ;;  %383 = vmatpush3.bf16.msra.mxu1 %v410_v17 }
  0x47   :  { %365 = vmatmul.mubr.bf16.vlgmr.msra.gmra.mrb[0].mxu0 %v402_v15 }
 0x11a   :  { %v162_v19 = vpop.f32.mrb[0].mxu0 }
 0x11b   :  { %v163_v20 = vadd.f32 %v302_v18, %v162_v19  ;;  %v366_v21 = vpop.f32.mrb[1].mxu0 }
 0x11c   :  { %v165_v22 = vpop.f32.mrb[2].mxu0 }
 0x11d   :  { %v166_v23 = vadd.f32 %v302_v18, %v165_v22  ;;  %v367_v24 = vpop.f32.mrb[3].mxu0  ;;  %v169_v25 = vmax.f32 %v163_v20, 0.0 }
 0x11f   :  { %v170_v26 = vmax.f32 %v166_v23, 0.0 }
 0x121   :  { %v171_v27 = vpack.c.bf16 %v170_v26, %v169_v25 }
 0x123   :  { %385 = vmatmul.mubr.bf16.vlgmr.msra.gmra.mrb[0].mxu1 %v171_v27 }
 0x1f6   :  { %v277_v29 = vpop.f32.mrb[0].mxu1 }
 0x1f7   :  { %v278_v30 = vadd.f32 %v312_v28, %v277_v29  ;;  %v386_v31 = vpop.f32.mrb[1].mxu1 }
 0x1f8   :  { %v280_v32 = vpop.f32.mrb[2].mxu1 }
 0x1f9   :  { %v281_v33 = vadd.f32 %v312_v28, %v280_v32  ;;  %v387_v34 = vpop.f32.mrb[3].mxu1  ;;  %v284_v35 = vmax.f32 %v278_v30, 0.0 }
 0x1fb   :  { %v285_v36 = vmax.f32 %v281_v33, 0.0 }
 0x1fd   :  { %v328_v37 = vpack.c.bf16 %v285_v36, %v284_v35 }
 0x1ff   :  { %329 = vst [vmem:[%s536_s5] sm:$0xff] %v328_v37  }
 0x200   :  { %300 = vsyncpa [#allocation3], 1 }
 0x201   :  { %301 = vsyncpa [#allocation5], 1 }

</bundles_post_ra>
